<compile_context>
chip_gen: v7x
topology: tpu7x:2x2x1
jax: 0.10.0
libtpu: 0.0.40
codegen_flags: <defaults>
</compile_context>

<pallas_src>
import functools

import jax
import jax.numpy as jnp
from jax.experimental import pallas as pl
from jax.experimental.pallas import tpu as pltpu


def _round_up(x, m):
    return ((x + m - 1) // m) * m


def _pick_tile(n, cap):
    """Largest tile <= cap that divides n (n is a multiple of 128, cap a pow2*128)."""
    t = min(cap, n)
    while n % t != 0:
        t //= 2
    return t


def _vmem_capacity_bytes():
    try:
        return int(pltpu.get_tpu_info().vmem_capacity_bytes)
    except Exception:
        return 64 << 20  # conservative fallback: v7x per-TensorCore VMEM


def _pad_cast(a, rows, cols, dtype):
    """Cast to dtype and zero-pad to (rows, cols); no-op pad if already aligned."""
    a = a.astype(dtype)
    r, c = a.shape
    if (r, c) == (rows, cols):
        return a
    return jnp.zeros((rows, cols), dtype).at[:r, :c].set(a)


# ---------------- Phase 1: h = x @ Wa^T + b_a ------------------------------

def _feat_kernel(x_ref, wa_ref, ba_ref, h_ref, acc_ref):
    k = pl.program_id(1)

    @pl.when(k == 0)
    def _():
        acc_ref[...] = jnp.zeros_like(acc_ref)

    acc_ref[...] += jnp.dot(x_ref[...], wa_ref[...],
                            preferred_element_type=jnp.float32)

    @pl.when(k == pl.num_programs(1) - 1)
    def _():
        h_ref[...] = (acc_ref[...] + ba_ref[...]).astype(h_ref.dtype)


# ---------------- Phase 2: relu(relu(adj @ h) @ Wd^T + b_d) ----------------

def _conv_kernel(adj_ref, h_ref, wd_ref, bd_ref, out_ref, acc_ref, *, tk,
                 h_resident):
    k = pl.program_id(1)

    @pl.when(k == 0)
    def _():
        acc_ref[...] = jnp.zeros_like(acc_ref)

    if h_resident:
        start = pl.multiple_of(k * tk, 128)
        h_blk = h_ref[pl.ds(start, tk), :]
    else:
        h_blk = h_ref[...]

    acc_ref[...] += jnp.dot(adj_ref[...], h_blk,
                            preferred_element_type=jnp.float32)

    @pl.when(k == pl.num_programs(1) - 1)
    def _():
        # relu in f32, then feed the MXU in bf16 (f32 accumulation).
        a = jnp.maximum(acc_ref[...], 0.0).astype(jnp.bfloat16)
        d = jnp.dot(a, wd_ref[...],
                    preferred_element_type=jnp.float32) + bd_ref[...]
        out_ref[...] = jnp.maximum(d, 0.0).astype(out_ref.dtype)


def gcn_layer(x, adj, w_a, b_a, w_d, b_d, *, tile_m_cap=512, tile_k_cap=2048):
    """x: (N, F_in), adj: (N, N), w_a: (F_out, F_in), w_d: (F_out, F_out)."""
    N, F_in = x.shape
    F_out = w_a.shape[0]

    n_pad = _round_up(N, 128)
    k_in = _round_up(F_in, 128)
    f_pad = _round_up(F_out, 128)

    bf16 = jnp.bfloat16
    f32 = jnp.float32

    # Generation-aware VMEM budget (v5e/v6e 128 MiB, v7x 64 MiB physical).
    cap = _vmem_capacity_bytes()
    budget = min(cap // 2, 48 << 20)

    # Row tile: big, but keep >= 2 tiles so the "parallel" axis can shard over
    # both v7x TensorCores.
    tm = _pick_tile(n_pad, tile_m_cap)
    if n_pad >= 256 and n_pad // tm < 2:
        tm = n_pad // 2
    # adj reduction tile; shrink if the double-buffered bf16 block overshoots.
    tk = _pick_tile(n_pad, tile_k_cap)
    while 2 * tm * tk * 2 > budget // 2 and tk > 128:
        tk //= 2
    while 2 * tm * tk * 2 > budget // 2 and tm > 128:
        tm //= 2
    # phase-1 K tile (keeps large F_in within budget on v7x).
    tk1 = _pick_tile(k_in, tile_k_cap)
    while (2 * tm * tk1 * 2 + 2 * tk1 * f_pad * 2) > budget // 2 and tk1 > 128:
        tk1 //= 2

    # Keep h resident in phase 2 when it fits comfortably (removes the
    # (n_pad/tm)x redundant re-reads of h).
    h_bytes = n_pad * f_pad * 2
    h_resident = (2 * h_bytes) <= (budget // 2)

    def _limit(need):
        # Explicit scoped-VMEM limit (v5e default is only 16 MiB); clamp below
        # physical with headroom.
        return int(min(max(need + (16 << 20), 32 << 20), cap - (4 << 20)))

    phase1_need = (2 * tm * tk1 * 2 + 2 * tk1 * f_pad * 2 + 2 * f_pad * 4
                   + 2 * tm * f_pad * 2 + tm * f_pad * 4)
    phase2_h_vmem = 2 * h_bytes if h_resident else 2 * tk * f_pad * 2
    phase2_need = (2 * tm * tk * 2 + phase2_h_vmem + 2 * f_pad * f_pad * 2
                   + 2 * f_pad * 4 + 2 * tm * f_pad * 2 + tm * f_pad * 4)

    # Pad/cast directly in bf16 (zero padding leaves the math unchanged).
    x_p = _pad_cast(x, n_pad, k_in, bf16)
    adj_p = _pad_cast(adj, n_pad, n_pad, bf16)
    wa_t = _pad_cast(w_a.T, k_in, f_pad, bf16)
    wd_t = _pad_cast(w_d.T, f_pad, f_pad, bf16)
    ba_p = _pad_cast(b_a.reshape(1, -1), 1, f_pad, f32)
    bd_p = _pad_cast(b_d.reshape(1, -1), 1, f_pad, f32)

    # ---------------- Phase 1 ----------------
    h = pl.pallas_call(
        _feat_kernel,
        out_shape=jax.ShapeDtypeStruct((n_pad, f_pad), bf16),
        grid=(n_pad // tm, k_in // tk1),
        in_specs=[
            pl.BlockSpec((tm, tk1), lambda i, k: (i, k)),       # x (streamed)
            pl.BlockSpec((tk1, f_pad), lambda i, k: (k, 0)),    # Wa^T
            pl.BlockSpec((1, f_pad), lambda i, k: (0, 0)),      # b_a (resident)
        ],
        out_specs=pl.BlockSpec((tm, f_pad), lambda i, k: (i, 0)),
        scratch_shapes=[pltpu.VMEM((tm, f_pad), jnp.float32)],
        compiler_params=pltpu.CompilerParams(
            dimension_semantics=("parallel", "arbitrary"),
            vmem_limit_bytes=_limit(phase1_need)),
    )(x_p, wa_t, ba_p)

    # ---------------- Phase 2 ----------------
    if h_resident:
        h_spec = pl.BlockSpec((n_pad, f_pad), lambda i, k: (0, 0))  # resident
    else:
        h_spec = pl.BlockSpec((tk, f_pad), lambda i, k: (k, 0))     # streamed

    n_row_tiles = n_pad // tm
    flops = 2 * n_pad * n_pad * f_pad + 2 * n_pad * f_pad * f_pad
    h_traffic = h_bytes * (1 if h_resident else n_row_tiles)
    bytes_accessed = (n_pad * n_pad * 2      # adj (bf16)
                      + h_traffic            # h   (bf16, resident or re-read)
                      + f_pad * f_pad * 2    # Wd^T (bf16)
                      + n_pad * f_pad * 2)   # out (bf16)

    conv = functools.partial(_conv_kernel, tk=tk, h_resident=h_resident)
    out_p = pl.pallas_call(
        conv,
        out_shape=jax.ShapeDtypeStruct((n_pad, f_pad), bf16),
        grid=(n_pad // tm, n_pad // tk),
        in_specs=[
            pl.BlockSpec((tm, tk), lambda i, k: (i, k)),        # adj (streamed)
            h_spec,                                             # h
            pl.BlockSpec((f_pad, f_pad), lambda i, k: (0, 0)),  # Wd^T (resident)
            pl.BlockSpec((1, f_pad), lambda i, k: (0, 0)),      # b_d  (resident)
        ],
        out_specs=pl.BlockSpec((tm, f_pad), lambda i, k: (i, 0)),
        scratch_shapes=[pltpu.VMEM((tm, f_pad), jnp.float32)],
        compiler_params=pltpu.CompilerParams(
            dimension_semantics=("parallel", "arbitrary"),
            vmem_limit_bytes=_limit(phase2_need)),
        cost_estimate=pl.CostEstimate(
            flops=flops, transcendentals=0, bytes_accessed=bytes_accessed),
    )(adj_p, h, wd_t, bd_p)

    return out_p[:N, :F_out].astype(jnp.float32)


def gcn_reference(x, adj, w_a, b_a, w_d, b_d):
    h = x @ w_a.T + b_a
    c = adj @ h
    a = jnp.maximum(c, 0.0)
    d = a @ w_d.T + b_d
    return jnp.maximum(d, 0.0)


if __name__ == "__main__":
    N = 8            # number of graph nodes
    F_in = 16        # in_features
    F_out = 32       # out_features

    key = jax.random.PRNGKey(0)
    k_x, k_adj, k_wa, k_ba, k_wd, k_bd = jax.random.split(key, 6)

    x = jax.random.normal(k_x, (N, F_in), dtype=jnp.float32)
    # symmetric, row-normalized adjacency with self loops
    a_raw = (jax.random.uniform(k_adj, (N, N)) > 0.6).astype(jnp.float32)
    adj = jnp.maximum(a_raw, a_raw.T) + jnp.eye(N, dtype=jnp.float32)
    adj = adj / jnp.sum(adj, axis=-1, keepdims=True)

    # deterministic nn.Linear-style init (uniform in +/- 1/sqrt(fan_in))
    lim_a = 1.0 / float(jnp.sqrt(jnp.float32(F_in)))
    lim_d = 1.0 / float(jnp.sqrt(jnp.float32(F_out)))
    w_a = jax.random.uniform(k_wa, (F_out, F_in), minval=-lim_a, maxval=lim_a)
    b_a = jax.random.uniform(k_ba, (F_out,), minval=-lim_a, maxval=lim_a)
    w_d = jax.random.uniform(k_wd, (F_out, F_out), minval=-lim_d, maxval=lim_d)
    b_d = jax.random.uniform(k_bd, (F_out,), minval=-lim_d, maxval=lim_d)

    out = gcn_layer(x, adj, w_a, b_a, w_d, b_d)
    out = jax.block_until_ready(out)

    ref = gcn_reference(x, adj, w_a, b_a, w_d, b_d)
    assert out.shape == (N, F_out)
    # bf16 MXU inputs / bf16 output (f32 accumulation) -> loosened tolerance.
    err = float(jnp.max(jnp.abs(out - ref)))
    assert jnp.allclose(out, ref, atol=5e-2, rtol=5e-2), err

    print("KERNEL_OK")
</pallas_src>

<mosaic_0001>
module attributes {stable_mosaic.version = 11 : i64} {
  func.func @_feat_kernel(%arg0: i32, %arg1: i32, %arg2: memref<128x128xbf16, #tpu.memory_space<vmem>>, %arg3: memref<128x128xbf16, #tpu.memory_space<vmem>>, %arg4: memref<1x128xf32, #tpu.memory_space<vmem>>, %arg5: memref<128x128xbf16, #tpu.memory_space<vmem>>, %arg6: memref<128x128xf32, #tpu.memory_space<vmem>>) attributes {dimension_semantics = [#tpu.dimension_semantics<parallel>, #tpu.dimension_semantics<arbitrary>], iteration_bounds = array<i64: 1, 1>, scalar_prefetch = 0 : i64, scratch_operands = 1 : i64, tpu.core_type = #tpu.core_type<tc>, window_params = [{transform_indices = @transform_0, window_bounds = array<i64: 128, 128>}, {transform_indices = @transform_1, window_bounds = array<i64: 128, 128>}, {pipeline_mode = #tpu.pipeline_mode<synchronous>, transform_indices = @transform_2, window_bounds = array<i64: 1, 128>}, {transform_indices = @transform_3, window_bounds = array<i64: 128, 128>}]} {
    %c0_i32 = arith.constant 0 : i32
    %0 = arith.cmpi eq, %arg1, %c0_i32 : i32
    %1 = arith.extui %0 : i1 to i32
    %c0_i32_0 = arith.constant 0 : i32
    %2 = arith.cmpi ne, %1, %c0_i32_0 : i32
    scf.if %2 {
      %cst_10 = arith.constant 0.000000e+00 : f32
      %12 = vector.broadcast %cst_10 : f32 to vector<128x128xf32>
      %c0_11 = arith.constant 0 : index
      %c0_12 = arith.constant 0 : index
      %13 = vector.load %arg6[%c0_11, %c0_12] : memref<128x128xf32, #tpu.memory_space<vmem>>, vector<128x128xf32>
      tpu.vector_store %arg6[%c0_11, %c0_12], %12 {strides = array<i32>} : memref<128x128xf32, #tpu.memory_space<vmem>>, vector<128x128xf32>,
    } else {
    }
    %c0 = arith.constant 0 : index
    %c0_1 = arith.constant 0 : index
    %3 = vector.load %arg6[%c0, %c0_1] : memref<128x128xf32, #tpu.memory_space<vmem>>, vector<128x128xf32>
    %c0_2 = arith.constant 0 : index
    %c0_3 = arith.constant 0 : index
    %4 = vector.load %arg2[%c0_2, %c0_3] : memref<128x128xbf16, #tpu.memory_space<vmem>>, vector<128x128xbf16>
    %c0_4 = arith.constant 0 : index
    %c0_5 = arith.constant 0 : index
    %5 = vector.load %arg3[%c0_4, %c0_5] : memref<128x128xbf16, #tpu.memory_space<vmem>>, vector<128x128xbf16>
    %cst = arith.constant dense<0.000000e+00> : vector<128x128xf32>
    %6 = tpu.matmul %4, %5, %cst {dimension_numbers = #tpu.dot_dimension_numbers<[1], [0], [0], [1], [0, 0, 1, 1], [], []>} : vector<128x128xbf16>, vector<128x128xbf16>, vector<128x128xf32> -> vector<128x128xf32>
    %7 = arith.addf %3, %6 : vector<128x128xf32>
    %c0_6 = arith.constant 0 : index
    %c0_7 = arith.constant 0 : index
    %8 = vector.load %arg6[%c0_6, %c0_7] : memref<128x128xf32, #tpu.memory_space<vmem>>, vector<128x128xf32>
    tpu.vector_store %arg6[%c0_6, %c0_7], %7 {strides = array<i32>} : memref<128x128xf32, #tpu.memory_space<vmem>>, vector<128x128xf32>,
    %c0_i32_8 = arith.constant 0 : i32
    %9 = arith.cmpi eq, %arg1, %c0_i32_8 : i32
    %10 = arith.extui %9 : i1 to i32
    %c0_i32_9 = arith.constant 0 : i32
    %11 = arith.cmpi ne, %10, %c0_i32_9 : i32
    scf.if %11 {
      %c0_10 = arith.constant 0 : index
      %c0_11 = arith.constant 0 : index
      %12 = vector.load %arg6[%c0_10, %c0_11] : memref<128x128xf32, #tpu.memory_space<vmem>>, vector<128x128xf32>
      %c0_12 = arith.constant 0 : index
      %c0_13 = arith.constant 0 : index
      %13 = vector.load %arg4[%c0_12, %c0_13] : memref<1x128xf32, #tpu.memory_space<vmem>>, vector<1x128xf32>
      %14 = vector.broadcast %13 : vector<1x128xf32> to vector<128x128xf32>
      %15 = arith.addf %12, %14 : vector<128x128xf32>
      %16 = arith.truncf %15 : vector<128x128xf32> to vector<128x128xbf16>
      %c0_14 = arith.constant 0 : index
      %c0_15 = arith.constant 0 : index
      %17 = vector.load %arg5[%c0_14, %c0_15] : memref<128x128xbf16, #tpu.memory_space<vmem>>, vector<128x128xbf16>
      tpu.vector_store %arg5[%c0_14, %c0_15], %16 {strides = array<i32>} : memref<128x128xbf16, #tpu.memory_space<vmem>>, vector<128x128xbf16>,
    } else {
    }
    return
  }
  func.func @transform_0(%arg0: i32, %arg1: i32) -> (i32, i32) {
    %c0_i32 = arith.constant 0 : i32
    return %arg0, %arg1 : i32, i32
  }
  func.func @transform_1(%arg0: i32, %arg1: i32) -> (i32, i32) {
    %c0_i32 = arith.constant 0 : i32
    %c0_i32_0 = arith.constant 0 : i32
    return %arg1, %c0_i32 : i32, i32
  }
  func.func @transform_2(%arg0: i32, %arg1: i32) -> (i32, i32) {
    %c0_i32 = arith.constant 0 : i32
    %c0_i32_0 = arith.constant 0 : i32
    %c0_i32_1 = arith.constant 0 : i32
    return %c0_i32, %c0_i32_0 : i32, i32
  }
  func.func @transform_3(%arg0: i32, %arg1: i32) -> (i32, i32) {
    %c0_i32 = arith.constant 0 : i32
    %c0_i32_0 = arith.constant 0 : i32
    return %arg0, %c0_i32 : i32, i32
  }
}

</mosaic_0001>

<bundles_post_ra>
// kernel: tpu_custom_call.1
= control target key start
LH: loop header
LB: loop body
LE: loop exit
PB: predicated region body
PF: predicated region fallthrough
CT: control target
= control target key end

     0   :  { %8 = vsyncpa [#allocation4], 0  ;;  %s803_s0 = inlined_call_operand.hbm [shape: bf16[128,128], index: 0, kind: input, shape index: {}]   ;;  %s804_s1 = inlined_call_operand.hbm [shape: bf16[128,128], index: 1, kind: input, shape index: {}]   ;;  %s805_s2 = inlined_call_operand.vmem [shape: f32[1,128], index: 2, kind: input, shape index: {}]   ;;  %s806_s3 = inlined_call_operand.hbm [shape: bf16[128,128], index: 3, kind: output, shape index: {}]  }
   0x1   :  { %9 = vsyncpa [#allocation7], 0 }
   0x2   :  { %10 = vsyncpa [#allocation5], 0  ;;  %s730_s12 = smov [#allocation3]   ;;  %s658_s16 = scalar_lea.hbm %s803_s0, 1024 }
   0x3   :  { %s16_s13 = sshll.u32 %s730_s12, 4  ;;  %p659_p0 = scmp.ne.s32.totalorder %s803_s0, %s658_s16  ;;  %s17_s13 = int_to_ptr.vmem [resolvable:$true] %s16_s13 }
   0x4   :  { %p662_p1 = scmp.lt.u32.totalorder %s658_s16, %s803_s0 }
   0x6   :  { %p664_p2 = pnand %p662_p1, %p659_p0 }
   0x8   :  { %667 = shalt.err (!%p664_p2)
}
   0x9   :  { %s668_s21 = scalar_lea.vmem %s17_s13, 1024  ;;  %p673_p4 = scmp.lt.s32.totalorder %s17_s13, %s17_s13 }
   0xa   :  { %p669_p3 = scmp.ne.s32.totalorder %s17_s13, %s668_s21  ;;  %p674_p5 = scmp.lt.s32.totalorder %s668_s21, %s668_s21 }
   0xc   :  { %p675_p6 = por %p674_p5, %p673_p4 }
   0xe   :  { %p676_p7 = pnand %p675_p6, %p669_p3 }
  0x10   :  { %679 = shalt.err (!%p676_p7)
}
  0x11   :  { %s731_s22 = smov 64   ;;  %s732_s23 = smov 4  }
  0x12   :  { %22 = dma.hbm_to_vmem [thread:$0]  %s803_s0, 1024, %s17_s13, [#allocation4], %s731_s22, %s731_s22, %s732_s23  }
  0x13   :  { %s733_s26 = smov [#allocation6]   ;;  %s680_s30 = scalar_lea.hbm %s804_s1, 1024 }
  0x14   :  { %s28_s27 = sshll.u32 %s733_s26, 4  ;;  %p681_p8 = scmp.ne.s32.totalorder %s804_s1, %s680_s30  ;;  %s29_s27 = int_to_ptr.vmem [resolvable:$true] %s28_s27 }
  0x15   :  { %p684_p9 = scmp.lt.u32.totalorder %s680_s30, %s804_s1 }
  0x17   :  { %p686_p10 = pnand %p684_p9, %p681_p8 }
  0x19   :  { %689 = shalt.err (!%p686_p10)
}
  0x1a   :  { %s690_s8 = scalar_lea.vmem %s29_s27, 1024  ;;  %p695_p12 = scmp.lt.s32.totalorder %s29_s27, %s29_s27 }
  0x1b   :  { %p691_p11 = scmp.ne.s32.totalorder %s29_s27, %s690_s8  ;;  %p696_p13 = scmp.lt.s32.totalorder %s690_s8, %s690_s8 }
  0x1d   :  { %p697_p0 = por %p696_p13, %p695_p12 }
  0x1f   :  { %p698_p1 = pnand %p697_p0, %p691_p11 }
  0x21   :  { %701 = shalt.err (!%p698_p1)
}
  0x22   :  { %34 = dma.hbm_to_vmem [thread:$0]  %s804_s1, 1024, %s29_s27, [#allocation7], %s731_s22, %s731_s22, %s732_s23  }
  0x23   :  { %724 = dma.done.wait [#allocation4], 1024  }
  0x24   :  { %725 = vsyncadd [#allocation4], 4294966272 }
  0x25   :  { %726 = dma.done.wait [#allocation7], 1024  }
  0x26   :  { %727 = vsyncadd [#allocation7], 4294966272  ;;  %v642_v0 = vld [vmem:[#allocation6] sm:$0xff]   ;;  %v643_v1 = vld [vmem:[#allocation6 + $0x8] sm:$0xff]  }
  0x27   :  { %589 = vmatprep.subr.bf16.mxu0 %v642_v0  ;;  %621 = vmatprep.subr.bf16.mxu1 %v642_v0  ;;  %v644_v2 = vld [vmem:[#allocation6 + $0x10] sm:$0xff]   ;;  %v645_v3 = vld [vmem:[#allocation6 + $0x18] sm:$0xff]   ;;  %v650_v4 = vld [vmem:[#allocation3] sm:$0xff]  }
  0x28   :  { %590 = vmatpush3.bf16.msra.mxu0 %v642_v0  ;;  %629 = vmatpush3.bf16.msra.mxu1 %v642_v0  ;;  %v651_v5 = vld [vmem:[#allocation3 + $0x20] sm:$0xff]   ;;  %v647_v7 = vld [vmem:[#allocation6 + $0x28] sm:$0xff]   ;;  %v648_v8 = vld [vmem:[#allocation6 + $0x30] sm:$0xff]  }
  0x29   :  { %591 = vmatprep.subr.bf16.mxu0 %v643_v1  ;;  %622 = vmatprep.subr.bf16.mxu1 %v643_v1  ;;  %v646_v6 = vld [vmem:[#allocation6 + $0x20] sm:$0xff]   ;;  %v649_v9 = vld [vmem:[#allocation6 + $0x38] sm:$0xff]   ;;  %v652_v10 = vld [vmem:[#allocation3 + $0x8] sm:$0xff]  }
  0x2a   :  { %605 = vmatprep.mubr.bf16.mxu0 %v650_v4  ;;  %613 = vmatprep.mubr.bf16.mxu1 %v651_v5  ;;  %v653_v11 = vld [vmem:[#allocation3 + $0x28] sm:$0xff]   ;;  %v654_v12 = vld [vmem:[#allocation3 + $0x10] sm:$0xff]   ;;  %v656_v14 = vld [vmem:[#allocation3 + $0x18] sm:$0xff]  }
  0x2b   :  { %v655_v13 = vld [vmem:[#allocation3 + $0x30] sm:$0xff]   ;;  %v657_v15 = vld [vmem:[#allocation3 + $0x38] sm:$0xff]   ;;  %v493_v17 = vld [vmem:[%s805_s2] ss:$0 sm:$0xff]  ;;  %s734_s2 = smov [#allocation8]  }
  0x2c   :  { %592 = vmatpush3.bf16.msra.mxu0 %v643_v1  ;;  %630 = vmatpush3.bf16.msra.mxu1 %v643_v1  ;;  %s464_s11 = sshll.u32 %s734_s2, 4  ;;  %s465_s11 = int_to_ptr.vmem [resolvable:$true] %s464_s11 }
  0x2d   :  { %593 = vmatprep.subr.bf16.mxu0 %v644_v2  ;;  %623 = vmatprep.subr.bf16.mxu1 %v644_v2  ;;  %s702_s12 = scalar_lea.vmem %s465_s11, 1024  ;;  %p707_p3 = scmp.lt.s32.totalorder %s465_s11, %s465_s11 }
  0x2e   :  { %p703_p2 = scmp.ne.s32.totalorder %s465_s11, %s702_s12  ;;  %p708_p4 = scmp.lt.s32.totalorder %s702_s12, %s702_s12 }
  0x30   :  { %594 = vmatpush3.bf16.msra.mxu0 %v644_v2  ;;  %631 = vmatpush3.bf16.msra.mxu1 %v644_v2  ;;  %p709_p5 = por %p708_p4, %p707_p3 }
  0x31   :  { %595 = vmatprep.subr.bf16.mxu0 %v645_v3  ;;  %624 = vmatprep.subr.bf16.mxu1 %v645_v3 }
  0x32   :  { %p710_p6 = pnand %p709_p5, %p703_p2 }
  0x34   :  { %596 = vmatpush3.bf16.msra.mxu0 %v645_v3  ;;  %632 = vmatpush3.bf16.msra.mxu1 %v645_v3 }
  0x35   :  { %597 = vmatprep.subr.bf16.mxu0 %v646_v6  ;;  %625 = vmatprep.subr.bf16.mxu1 %v646_v6 }
  0x38   :  { %598 = vmatpush3.bf16.msra.mxu0 %v646_v6  ;;  %633 = vmatpush3.bf16.msra.mxu1 %v646_v6 }
  0x39   :  { %599 = vmatprep.subr.bf16.mxu0 %v647_v7  ;;  %626 = vmatprep.subr.bf16.mxu1 %v647_v7 }
  0x3c   :  { %600 = vmatpush3.bf16.msra.mxu0 %v647_v7  ;;  %634 = vmatpush3.bf16.msra.mxu1 %v647_v7 }
  0x3d   :  { %601 = vmatprep.subr.bf16.mxu0 %v648_v8  ;;  %627 = vmatprep.subr.bf16.mxu1 %v648_v8 }
  0x40   :  { %602 = vmatpush3.bf16.msra.mxu0 %v648_v8  ;;  %635 = vmatpush3.bf16.msra.mxu1 %v648_v8 }
  0x41   :  { %603 = vmatprep.subr.bf16.mxu0 %v649_v9  ;;  %628 = vmatprep.subr.bf16.mxu1 %v649_v9 }
  0x44   :  { %604 = vmatpush3.bf16.msra.mxu0 %v649_v9  ;;  %636 = vmatpush3.bf16.msra.mxu1 %v649_v9 }
  0x47   :  { %606 = vmatmul.mubr.bf16.vlgmr.msra.gmra.mrb[0].mxu0 %v652_v10  ;;  %614 = vmatmul.mubr.bf16.vlgmr.msra.gmra.mrb[0].mxu1 %v653_v11 }
  0x48   :  { %609 = vmatprep.mubr.bf16.mxu0 %v654_v12  ;;  %617 = vmatprep.mubr.bf16.mxu1 %v655_v13 }
  0x4f   :  { %610 = vmatmul.mubr.bf16.gmra.mrb[4].mxu0 %v656_v14  ;;  %618 = vmatmul.mubr.bf16.gmra.mrb[4].mxu1 %v657_v15 }
 0x11a   :  { %v607_v16 = vpop.f32.mrb[0].mxu0  ;;  %v615_v18 = vpop.f32.mrb[0].mxu1 }
 0x11b   :  { %v242_v19 = vpop.f32.mrb[1].mxu0  ;;  %v274_v20 = vpop.f32.mrb[1].mxu1  ;;  %v365_v23 = vadd.f32 %v607_v16, %v493_v17  ;;  %v373_v24 = vadd.f32 %v615_v18, %v493_v17 }
 0x11c   :  { %v608_v21 = vpop.f32.mrb[2].mxu0  ;;  %v616_v22 = vpop.f32.mrb[2].mxu1  ;;  %v363_v29 = vadd.f32 %v493_v17, %v242_v19  ;;  %v371_v30 = vadd.f32 %v493_v17, %v274_v20 }
 0x11d   :  { %v366_v25 = vadd.f32 %v608_v21, %v493_v17  ;;  %v374_v26 = vadd.f32 %v616_v22, %v493_v17  ;;  %v245_v27 = vpop.f32.mrb[3].mxu0  ;;  %v277_v28 = vpop.f32.mrb[3].mxu1 }
 0x11e   :  { %v364_v31 = vadd.f32 %v493_v17, %v245_v27  ;;  %v372_v32 = vadd.f32 %v493_v17, %v277_v28 }
 0x11f   :  { %v534_v33 = vpack.c.bf16 %v366_v25, %v365_v23  ;;  %v554_v34 = vpack.c.bf16 %v374_v26, %v373_v24 }
 0x120   :  { %v529_v35 = vpack.c.bf16 %v364_v31, %v363_v29  ;;  %v549_v36 = vpack.c.bf16 %v372_v32, %v371_v30 }
 0x121   :  { %566 = vst [vmem:[#allocation8 + $0x8] sm:$0xff] %v534_v33   ;;  %570 = vst [vmem:[#allocation8 + $0x28] sm:$0xff] %v554_v34  }
 0x122   :  { %530 = vst [vmem:[#allocation8] sm:$0xff] %v529_v35   ;;  %569 = vst [vmem:[#allocation8 + $0x20] sm:$0xff] %v549_v36   ;;  %v611_v37 = vpop.f32.mrb[4].mxu0  ;;  %v619_v38 = vpop.f32.mrb[4].mxu1 }
 0x123   :  { %v258_v39 = vpop.f32.mrb[5].mxu0  ;;  %v290_v40 = vpop.f32.mrb[5].mxu1  ;;  %v369_v43 = vadd.f32 %v611_v37, %v493_v17  ;;  %v377_v44 = vadd.f32 %v619_v38, %v493_v17 }
 0x124   :  { %v612_v41 = vpop.f32.mrb[6].mxu0  ;;  %v620_v42 = vpop.f32.mrb[6].mxu1  ;;  %v367_v49 = vadd.f32 %v493_v17, %v258_v39  ;;  %v375_v50 = vadd.f32 %v493_v17, %v290_v40 }
 0x125   :  { %v370_v45 = vadd.f32 %v612_v41, %v493_v17  ;;  %v378_v46 = vadd.f32 %v620_v42, %v493_v17  ;;  %v261_v47 = vpop.f32.mrb[7].mxu0  ;;  %v293_v48 = vpop.f32.mrb[7].mxu1 }
 0x126   :  { %v368_v51 = vadd.f32 %v493_v17, %v261_v47  ;;  %v376_v52 = vadd.f32 %v493_v17, %v293_v48 }
 0x127   :  { %v544_v53 = vpack.c.bf16 %v370_v45, %v369_v43  ;;  %v564_v54 = vpack.c.bf16 %v378_v46, %v377_v44 }
 0x128   :  { %v539_v55 = vpack.c.bf16 %v368_v51, %v367_v49  ;;  %v559_v56 = vpack.c.bf16 %v376_v52, %v375_v50 }
 0x129   :  { %568 = vst [vmem:[#allocation8 + $0x18] sm:$0xff] %v544_v53   ;;  %572 = vst [vmem:[#allocation8 + $0x38] sm:$0xff] %v564_v54  }
 0x12a   :  { %567 = vst [vmem:[#allocation8 + $0x10] sm:$0xff] %v539_v55   ;;  %571 = vst [vmem:[#allocation8 + $0x30] sm:$0xff] %v559_v56  }
 0x12b   :  { %713 = shalt.err (!%p710_p6)
}
 0x12c   :  { %s714_s15 = scalar_lea.hbm %s806_s3, 1024 }
 0x12d   :  { %p715_p7 = scmp.ne.s32.totalorder %s806_s3, %s714_s15  ;;  %p718_p8 = scmp.lt.u32.totalorder %s714_s15, %s806_s3 }
 0x12f   :  { %p720_p9 = pnand %p718_p8, %p715_p7 }
 0x131   :  { %723 = shalt.err (!%p720_p9)
}
 0x132   :  { %470 = dma.vmem_to_hbm [thread:$0]  %s465_s11, 1024, %s806_s3, [#allocation5], %s731_s22, %s731_s22, %s732_s23  }
 0x133   :  { %728 = dma.done.wait [#allocation5], 1024  }
 0x134   :  { %729 = vsyncadd [#allocation5], 4294966272 }
 0x135   :  { %474 = vsyncpa [#allocation4], 1 }
 0x136   :  { %475 = vsyncpa [#allocation7], 1 }
 0x137   :  { %476 = vsyncpa [#allocation5], 1 }

</bundles_post_ra>
